<compile_context>
chip_gen: v7x
topology: tpu7x:2x2x1
jax: 0.10.0
libtpu: 0.0.40
codegen_flags: <defaults>
</compile_context>

<pallas_src>
import jax
import jax.numpy as jnp
from jax.experimental import pallas as pl
from jax.experimental.pallas import tpu as pltpu


# --------------------------------------------------------------------------
# helpers: padding / tile planning
# --------------------------------------------------------------------------
def _round_up(x, m):
    return ((x + m - 1) // m) * m


def _sublane(itemsize):
    # dtype-aware sublane packing: f32 -> 8, bf16 -> 16, int8/fp8 -> 32
    return {4: 8, 2: 16, 1: 32}.get(itemsize, 8)


def _pick_tile(dim, cap, unit):
    """Largest t <= cap with t % unit == 0 and dim % t == 0.

    Falls back to the full dim when dim <= cap or when dim is not a multiple
    of `unit` (a full-dim block is always a legal block shape)."""
    if dim <= cap:
        return dim
    if dim % unit != 0:
        return dim
    best = unit
    t = unit
    while t <= cap:
        if dim % t == 0:
            best = t
        t += unit
    return best


def _vmem_budget():
    """(tile budget, physical VMEM capacity) in bytes, per chip generation."""
    cap = 64 << 20                       # conservative default (v7x physical)
    try:
        info = pltpu.get_tpu_info()
        cap = int(getattr(info, "vmem_capacity_bytes", cap) or cap)
    except Exception:
        pass
    # ~40% of physical for tile buffers, capped at 48 MiB
    # (v5e/v6e: 128 MiB -> 48 MiB; v7x: 64 MiB -> ~25 MiB as recommended).
    return min(int(cap * 0.40), 48 << 20), cap


def _footprint(tm, tk, tn, in_isz, out_isz):
    """Double-buffered VMEM footprint of one grid step (bytes)."""
    return (2 * tm * tk * in_isz          # x tile
            + 2 * tk * tn * in_isz        # w tile
            + 2 * tn * 4                  # bias tile (f32)
            + 2 * tm * tn * out_isz       # out tile
            + tm * tn * 4)                # f32 accumulator


def _choose_tiles(M, K, N_pad, in_isz, out_isz, budget):
    sub = _sublane(in_isz)

    # -- attempt 1: K and N untiled -> W is DMA'd exactly once and stays
    #    resident in VMEM (constant block index across i), x streamed once.
    tm = _pick_tile(M, 512, sub)
    while True:
        if _footprint(tm, K, N_pad, in_isz, out_isz) <= budget:
            return tm, K, N_pad
        if M % sub == 0 and tm > sub:
            smaller = _pick_tile(M, max(sub, tm // 2), sub)
            if smaller < tm:
                tm = smaller
                continue
        break

    # -- attempt 2: capped streaming tiles (still as large as fits).
    tm = _pick_tile(M, 512, sub)
    tk = _pick_tile(K, 2048, 128)
    tn = N_pad if N_pad <= 768 else _pick_tile(N_pad, 512, 128)
    for _ in range(32):
        if _footprint(tm, tk, tn, in_isz, out_isz) <= budget:
            break
        if K % 128 == 0 and tk > 128:
            tk = _pick_tile(K, max(128, tk // 2), 128)
        elif M % sub == 0 and tm > sub:
            tm = _pick_tile(M, max(sub, tm // 2), sub)
        elif tn > 128:
            tn = _pick_tile(N_pad, max(128, tn // 2), 128)
        else:
            break
    return tm, tk, tn


def _plan(M, K, N_pad, in_isz, out_isz, budget):
    """Pick (tm, tk, tn) plus how much of M / K must be zero-padded.

    Ragged M / K are handled with full-dim blocks (no extra HBM pass over x);
    padding is a last resort when such a block would not fit VMEM."""
    sub = _sublane(in_isz)
    tm, tk, tn = _choose_tiles(M, K, N_pad, in_isz, out_isz, budget)
    if (_footprint(tm, tk, tn, in_isz, out_isz) > budget
            and (M % sub != 0 or K % 128 != 0)):
        Mp, Kp = _round_up(M, sub), _round_up(K, 128)
        tm, tk, tn = _choose_tiles(Mp, Kp, N_pad, in_isz, out_isz, budget)
        return tm, tk, tn, Mp - M, Kp - K
    return tm, tk, tn, 0, 0


def _vmem_limit(footprint_bytes, cap):
    return int(min(max(footprint_bytes * 5 // 4 + (2 << 20), 32 << 20),
                   cap * 9 // 10))


# --------------------------------------------------------------------------
# shared tiled matmul + bias kernel (used by both heads)
#   x_ref: (tm, tk)   w_ref: (tk, tn)   b_ref: (1, tn)   o_ref: (tm, tn)
# The K-reduction grid axis is `k_axis` (innermost, "arbitrary").  When the K
# axis has a single step the f32 VMEM accumulator is elided entirely.
# --------------------------------------------------------------------------
def _make_mm_bias_kernel(k_axis, use_acc):
    if use_acc:
        def kernel(x_ref, w_ref, b_ref, o_ref, acc_ref):
            k = pl.program_id(k_axis)

            @pl.when(k == 0)
            def _():
                acc_ref[...] = jnp.zeros_like(acc_ref)

            acc_ref[...] += jnp.dot(
                x_ref[...], w_ref[...], preferred_element_type=jnp.float32
            )

            @pl.when(k == pl.num_programs(k_axis) - 1)
            def _():
                o_ref[...] = (
                    acc_ref[...] + b_ref[...].astype(jnp.float32)
                ).astype(o_ref.dtype)
    else:
        def kernel(x_ref, w_ref, b_ref, o_ref):
            acc = jnp.dot(
                x_ref[...], w_ref[...], preferred_element_type=jnp.float32
            )
            o_ref[...] = (acc + b_ref[...].astype(jnp.float32)).astype(o_ref.dtype)
    return kernel


# --------------------------------------------------------------------------
# individual = False : one shared Linear(nf, target_window)
# --------------------------------------------------------------------------
def flatten_head_shared(x, w, b, *, use_bf16=False):
    """x: [B, V, D, P]; w: [nf, tw]; b: [tw] -> [B, V, tw]."""
    B, V, D, P = x.shape
    nf = D * P
    assert w.shape[0] == nf, (w.shape, nf)
    tw = w.shape[1]
    out_dtype = x.dtype
    cdtype = jnp.bfloat16 if use_bf16 else x.dtype
    in_isz = jnp.dtype(cdtype).itemsize
    out_isz = jnp.dtype(out_dtype).itemsize
    sub = _sublane(in_isz)

    M = B * V
    N_pad = _round_up(tw, 128)            # lane-dense output stores
    budget, vmem_cap = _vmem_budget()

    tm, tk, tn, pad_m, pad_k = _plan(M, nf, N_pad, in_isz, out_isz, budget)
    M_w, K_w = M + pad_m, nf + pad_k

    # Megacore (v7x has 2 TCs): make sure there are >= 2 parallel blocks.
    if M_w // tm == 1 and N_pad // tn == 1:
        if N_pad // 128 >= 2:
            tn = _pick_tile(N_pad, N_pad // 2, 128)
        elif tm > sub and tm % 2 == 0 and (tm // 2) % sub == 0:
            tm //= 2

    # flatten(start_dim=-2) + fold (B, V): free reshape of contiguous dims.
    x2 = x.reshape(M, nf)
    if pad_m or pad_k:
        x2 = jnp.pad(x2, ((0, pad_m), (0, pad_k)))
    w_p = w
    if pad_k or N_pad != tw:
        w_p = jnp.pad(w, ((0, pad_k), (0, N_pad - tw)))
    b_p = (b if N_pad == tw else jnp.pad(b, (0, N_pad - tw)))
    b_p = b_p.reshape(1, N_pad).astype(jnp.float32)
    if x2.dtype != cdtype:
        x2 = x2.astype(cdtype)
    if w_p.dtype != cdtype:
        w_p = w_p.astype(cdtype)

    kt = K_w // tk
    use_acc = kt > 1
    kernel = _make_mm_bias_kernel(k_axis=2, use_acc=use_acc)
    grid = (M_w // tm, N_pad // tn, kt)
    fp = _footprint(tm, tk, tn, in_isz, out_isz)

    out = pl.pallas_call(
        kernel,
        out_shape=jax.ShapeDtypeStruct((M_w, N_pad), out_dtype),
        grid_spec=pltpu.PrefetchScalarGridSpec(
            num_scalar_prefetch=0,
            grid=grid,
            in_specs=[
                pl.BlockSpec((tm, tk), lambda i, j, k: (i, k)),
                # with kt == 1 and one j block, this index is constant -> W is
                # DMA'd once and stays resident across all i tiles.
                pl.BlockSpec((tk, tn), lambda i, j, k: (k, j)),
                # bias block constant across i and k -> resident in VMEM
                pl.BlockSpec((1, tn), lambda i, j, k: (0, j)),
            ],
            out_specs=pl.BlockSpec((tm, tn), lambda i, j, k: (i, j)),
            scratch_shapes=(
                [pltpu.VMEM((tm, tn), jnp.float32)] if use_acc else []
            ),
        ),
        compiler_params=pltpu.CompilerParams(
            dimension_semantics=("parallel", "parallel", "arbitrary"),
            vmem_limit_bytes=_vmem_limit(fp, vmem_cap),
        ),
    )(x2, w_p, b_p)

    return out[:M, :tw].reshape(B, V, tw)


# --------------------------------------------------------------------------
# individual = True : one Linear per variable
#   x is indexed through a flat [B, V*K] view (no HBM transpose) and the
#   output is written as a flat [B, V*N_pad] slab (no output transpose).
#   B is tiled so VMEM use stays bounded for large batch.
# --------------------------------------------------------------------------
def flatten_head_individual(x, w_stacked, b_stacked, *, use_bf16=False):
    """x: [B, V, D, P]; w_stacked: [V, nf, tw]; b_stacked: [V, tw] -> [B, V, tw]."""
    B, V, D, P = x.shape
    nf = D * P
    assert w_stacked.shape == (V, nf, w_stacked.shape[-1])
    tw = w_stacked.shape[-1]
    out_dtype = x.dtype
    cdtype = jnp.bfloat16 if use_bf16 else x.dtype
    in_isz = jnp.dtype(cdtype).itemsize
    out_isz = jnp.dtype(out_dtype).itemsize

    N_pad = _round_up(tw, 128)
    # Per-variable K stride in the flat view must be lane-aligned (x128).
    # TODO(synk): handle a ragged K remainder in-kernel to avoid this pad pass.
    K_w = nf if nf % 128 == 0 else _round_up(nf, 128)

    budget, vmem_cap = _vmem_budget()
    tb, tk, tn, pad_b_rows, _ = _plan(B, K_w, N_pad, in_isz, out_isz, budget)
    B_w = B + pad_b_rows
    kt = K_w // tk
    nt = N_pad // tn

    x3 = x.reshape(B, V, nf)                   # free reshape (contiguous dims)
    if K_w != nf:
        x3 = jnp.pad(x3, ((0, 0), (0, 0), (0, K_w - nf)))
    x_flat = x3.reshape(B, V * K_w)            # free when K_w == nf
    if pad_b_rows:
        x_flat = jnp.pad(x_flat, ((0, pad_b_rows), (0, 0)))

    w_p = w_stacked
    if (K_w, N_pad) != (nf, tw):
        w_p = jnp.pad(w_stacked, ((0, 0), (0, K_w - nf), (0, N_pad - tw)))
    b_p = b_stacked if N_pad == tw else jnp.pad(b_stacked, ((0, 0), (0, N_pad - tw)))
    b_p = b_p.reshape(V, 1, N_pad).astype(jnp.float32)
    if x_flat.dtype != cdtype:
        x_flat = x_flat.astype(cdtype)
    if w_p.dtype != cdtype:
        w_p = w_p.astype(cdtype)

    use_acc = kt > 1
    kernel = _make_mm_bias_kernel(k_axis=3, use_acc=use_acc)
    grid = (B_w // tb, V, nt, kt)

    # per-variable weight tile (V axis squeezed); 3-deep buffering keeps the
    # DMA engine busy across per-variable / per-K tile switches.
    w_idx = lambda bi, v, j, k: (v, k, j)
    w_spec = pl.BlockSpec((None, tk, tn), w_idx)
    if hasattr(pl, "Buffered"):
        try:
            w_spec = pl.BlockSpec((None, tk, tn), w_idx,
                                  pipeline_mode=pl.Buffered(3))
        except TypeError:
            pass

    fp = _footprint(tb, tk, tn, in_isz, out_isz) + tk * tn * in_isz  # 3rd W buf

    out = pl.pallas_call(
        kernel,
        out_shape=jax.ShapeDtypeStruct((B_w, V * N_pad), out_dtype),
        grid_spec=pltpu.PrefetchScalarGridSpec(
            num_scalar_prefetch=0,
            grid=grid,
            in_specs=[
                # variable v's features live at flat lane-block index v*kt + k
                pl.BlockSpec((tb, tk), lambda bi, v, j, k: (bi, v * kt + k)),
                w_spec,
                # per-variable bias tile; constant across bi and k
                pl.BlockSpec((None, 1, tn), lambda bi, v, j, k: (v, 0, j)),
            ],
            out_specs=pl.BlockSpec((tb, tn), lambda bi, v, j, k: (bi, v * nt + j)),
            scratch_shapes=(
                [pltpu.VMEM((tb, tn), jnp.float32)] if use_acc else []
            ),
        ),
        compiler_params=pltpu.CompilerParams(
            dimension_semantics=("parallel", "parallel", "parallel", "arbitrary"),
            vmem_limit_bytes=_vmem_limit(fp, vmem_cap),
        ),
    )(x_flat, w_p, b_p)

    # flat [B_w, V*N_pad] -> [B, V, tw]  (free reshape + slice, no transpose)
    return out[:B].reshape(B, V, N_pad)[:, :, :tw]


# --------------------------------------------------------------------------
if __name__ == "__main__":
    key = jax.random.PRNGKey(0)

    def _check(B, V, D, P, tw, use_bf16=False, atol=1e-4, rtol=1e-4):
        nf = D * P
        k1, k2, k3, k4, k5 = jax.random.split(
            jax.random.fold_in(key, B * 10000 + V * 100 + tw), 5)
        x = jax.random.normal(k1, (B, V, D, P), dtype=jnp.float32)

        # ---- individual=False : single shared Linear(nf, target_window) ----
        w = jax.random.normal(k2, (nf, tw), dtype=jnp.float32) * 0.05
        b = jax.random.normal(k3, (tw,), dtype=jnp.float32) * 0.05
        out_shared = jax.block_until_ready(
            flatten_head_shared(x, w, b, use_bf16=use_bf16))
        ref_shared = (jnp.dot(x.reshape(B * V, nf), w, precision="highest")
                      + b).reshape(B, V, tw)
        assert out_shared.shape == (B, V, tw)
        assert jnp.allclose(out_shared, ref_shared, atol=atol, rtol=rtol), (
            f"shared mismatch (use_bf16={use_bf16})")

        # ---- individual=True : one Linear per variable ----
        w_i = jax.random.normal(k4, (V, nf, tw), dtype=jnp.float32) * 0.05
        b_i = jax.random.normal(k5, (V, tw), dtype=jnp.float32) * 0.05
        out_ind = jax.block_until_ready(
            flatten_head_individual(x, w_i, b_i, use_bf16=use_bf16))
        ref_ind = jnp.einsum("bvf,vft->bvt", x.reshape(B, V, nf), w_i,
                             precision="highest") + b_i[None]
        assert out_ind.shape == (B, V, tw)
        assert jnp.allclose(out_ind, ref_ind, atol=atol, rtol=rtol), (
            f"individual mismatch (use_bf16={use_bf16})")

    # batch=2, n_vars=4, d_model=16, patch_num=8, target_window=32
    _check(B=2, V=4, D=16, P=8, tw=32)                         # aligned (nf=128)
    _check(B=3, V=2, D=10, P=7, tw=5)                          # ragged M/K/N
    _check(B=2, V=4, D=16, P=8, tw=32,
           use_bf16=True, atol=3e-2, rtol=3e-2)                # bf16 MXU path

    print("KERNEL_OK")
</pallas_src>

<mosaic_0001>
module attributes {stable_mosaic.version = 11 : i64} {
  func.func @kernel(%arg0: i32, %arg1: i32, %arg2: i32, %arg3: memref<8x128xf32, #tpu.memory_space<vmem>>, %arg4: memref<128x128xf32, #tpu.memory_space<vmem>>, %arg5: memref<1x128xf32, #tpu.memory_space<vmem>>, %arg6: memref<8x128xf32, #tpu.memory_space<vmem>>) attributes {dimension_semantics = [#tpu.dimension_semantics<parallel>, #tpu.dimension_semantics<parallel>, #tpu.dimension_semantics<arbitrary>], iteration_bounds = array<i64: 1, 1, 1>, scalar_prefetch = 0 : i64, scratch_operands = 0 : i64, tpu.core_type = #tpu.core_type<tc>, window_params = [{transform_indices = @transform_0, window_bounds = array<i64: 8, 128>}, {transform_indices = @transform_1, window_bounds = array<i64: 128, 128>}, {transform_indices = @transform_2, window_bounds = array<i64: 1, 128>}, {transform_indices = @transform_3, window_bounds = array<i64: 8, 128>}]} {
    %c0 = arith.constant 0 : index
    %c0_0 = arith.constant 0 : index
    %0 = vector.load %arg3[%c0, %c0_0] : memref<8x128xf32, #tpu.memory_space<vmem>>, vector<8x128xf32>
    %c0_1 = arith.constant 0 : index
    %c0_2 = arith.constant 0 : index
    %1 = vector.load %arg4[%c0_1, %c0_2] : memref<128x128xf32, #tpu.memory_space<vmem>>, vector<128x128xf32>
    %cst = arith.constant dense<0.000000e+00> : vector<8x128xf32>
    %2 = tpu.matmul %0, %1, %cst {dimension_numbers = #tpu.dot_dimension_numbers<[1], [0], [0], [1], [0, 0, 1, 1], [], []>} : vector<8x128xf32>, vector<128x128xf32>, vector<8x128xf32> -> vector<8x128xf32>
    %c0_3 = arith.constant 0 : index
    %c0_4 = arith.constant 0 : index
    %3 = vector.load %arg5[%c0_3, %c0_4] : memref<1x128xf32, #tpu.memory_space<vmem>>, vector<1x128xf32>
    %4 = vector.broadcast %3 : vector<1x128xf32> to vector<8x128xf32>
    %5 = arith.addf %2, %4 : vector<8x128xf32>
    %c0_5 = arith.constant 0 : index
    %c0_6 = arith.constant 0 : index
    %6 = vector.load %arg6[%c0_5, %c0_6] : memref<8x128xf32, #tpu.memory_space<vmem>>, vector<8x128xf32>
    tpu.vector_store %arg6[%c0_5, %c0_6], %5 {strides = array<i32>} : memref<8x128xf32, #tpu.memory_space<vmem>>, vector<8x128xf32>,
    return
  }
  func.func @transform_0(%arg0: i32, %arg1: i32, %arg2: i32) -> (i32, i32) {
    %c0_i32 = arith.constant 0 : i32
    return %arg0, %arg2 : i32, i32
  }
  func.func @transform_1(%arg0: i32, %arg1: i32, %arg2: i32) -> (i32, i32) {
    %c0_i32 = arith.constant 0 : i32
    return %arg2, %arg1 : i32, i32
  }
  func.func @transform_2(%arg0: i32, %arg1: i32, %arg2: i32) -> (i32, i32) {
    %c0_i32 = arith.constant 0 : i32
    %c0_i32_0 = arith.constant 0 : i32
    return %c0_i32, %arg1 : i32, i32
  }
  func.func @transform_3(%arg0: i32, %arg1: i32, %arg2: i32) -> (i32, i32) {
    %c0_i32 = arith.constant 0 : i32
    return %arg0, %arg1 : i32, i32
  }
}

</mosaic_0001>

<bundles_post_ra>
// kernel: tpu_custom_call.1
= control target key start
LH: loop header
LB: loop body
LE: loop exit
PB: predicated region body
PF: predicated region fallthrough
CT: control target
= control target key end

     0   :  { %8 = vsyncpa [#allocation3], 0  ;;  %s383_s0 = inlined_call_operand.hbm [shape: f32[8,128], index: 0, kind: input, shape index: {}]   ;;  %s384_s1 = inlined_call_operand.hbm [shape: f32[128,128], index: 1, kind: input, shape index: {}]   ;;  %s385_s2 = inlined_call_operand.vmem [shape: f32[1,128], index: 2, kind: input, shape index: {}]   ;;  %s386_s3 = inlined_call_operand.hbm [shape: f32[8,128], index: 3, kind: output, shape index: {}]  }
   0x1   :  { %9 = vsyncpa [#allocation6], 0 }
   0x2   :  { %10 = vsyncpa [#allocation4], 0  ;;  %s309_s12 = smov [#allocation2]   ;;  %s310_s14 = smov [#allocation5]  }
   0x3   :  { %s17_s13 = sshll.u32 %s309_s12, 4  ;;  %s26_s15 = sshll.u32 %s310_s14, 4  ;;  %s18_s13 = int_to_ptr.vmem [resolvable:$true] %s17_s13  ;;  %s337_s15 = int_to_ptr.vmem [resolvable:$true] %s26_s15 }
   0x4   :  { %s237_s18 = scalar_lea.hbm %s383_s0, 128 }
   0x5   :  { %p238_p0 = scmp.ne.s32.totalorder %s383_s0, %s237_s18  ;;  %p241_p1 = scmp.lt.u32.totalorder %s237_s18, %s383_s0 }
   0x7   :  { %p243_p2 = pnand %p241_p1, %p238_p0 }
   0x9   :  { %246 = shalt.err (!%p243_p2)
}
   0xa   :  { %s247_s23 = scalar_lea.vmem %s18_s13, 128  ;;  %p252_p4 = scmp.lt.s32.totalorder %s18_s13, %s18_s13 }
   0xb   :  { %p248_p3 = scmp.ne.s32.totalorder %s18_s13, %s247_s23  ;;  %p253_p5 = scmp.lt.s32.totalorder %s247_s23, %s247_s23 }
   0xd   :  { %p254_p6 = por %p253_p5, %p252_p4 }
   0xf   :  { %p255_p7 = pnand %p254_p6, %p248_p3 }
  0x11   :  { %258 = shalt.err (!%p255_p7)
}
  0x12   :  { %20 = dma.hbm_to_vmem [thread:$0]  %s383_s0, 128, %s18_s13, [#allocation3]  }
  0x13   :  { %s259_s28 = scalar_lea.hbm %s384_s1, 2048 }
  0x14   :  { %p260_p8 = scmp.ne.s32.totalorder %s384_s1, %s259_s28  ;;  %p263_p9 = scmp.lt.u32.totalorder %s259_s28, %s384_s1 }
  0x16   :  { %p265_p10 = pnand %p263_p9, %p260_p8 }
  0x18   :  { %268 = shalt.err (!%p265_p10)
}
  0x19   :  { %s269_s6 = scalar_lea.vmem %s337_s15, 2048  ;;  %p274_p12 = scmp.lt.s32.totalorder %s337_s15, %s337_s15 }
  0x1a   :  { %p270_p11 = scmp.ne.s32.totalorder %s337_s15, %s269_s6  ;;  %p275_p13 = scmp.lt.s32.totalorder %s269_s6, %s269_s6 }
  0x1c   :  { %p276_p0 = por %p275_p13, %p274_p12 }
  0x1e   :  { %p277_p1 = pnand %p276_p0, %p270_p11 }
  0x20   :  { %280 = shalt.err (!%p277_p1)
}
  0x21   :  { %s311_s0 = smov 128   ;;  %s312_s7 = smov 8  }
  0x22   :  { %32 = dma.hbm_to_vmem [thread:$0]  %s384_s1, 2048, %s337_s15, [#allocation6], %s311_s0, %s311_s0, %s312_s7  }
  0x23   :  { %303 = dma.done.wait [#allocation3], 128  }
  0x24   :  { %304 = vsyncadd [#allocation3], 4294967168 }
  0x25   :  { %305 = dma.done.wait [#allocation6], 2048  }
  0x26   :  { %306 = vsyncadd [#allocation6], 4294965248  ;;  %v313_v0 = vmov 0.0|0.0   ;;  %vm314_vm0 = vmmov 0   ;;  %v315_v1 = vmov 0.0   ;;  %v42_v2 = vld [vmem:[#allocation5] sm:$0xff] }
  0x27   :  { %205 = vmatprep.subr.bf16.mxu0 %v313_v0  ;;  %202 = vmatprep.mubr.msk.f32.mxu0 %vm314_vm0, %v315_v1  ;;  %v43_v3 = vld [vmem:[#allocation5 + $0x8] sm:$0xff]  ;;  %v44_v4 = vld [vmem:[#allocation5 + $0x10] sm:$0xff]  ;;  %v45_v6 = vld [vmem:[#allocation5 + $0x18] sm:$0xff]  ;;  %s316_s11 = smov [#allocation7]  }
  0x28   :  { %v206_v5 = vpack.c.bf16 %v43_v3, %v42_v2  ;;  %v209_v7 = vpack.c.bf16 %v45_v6, %v44_v4  ;;  %v46_v8 = vld [vmem:[#allocation5 + $0x20] sm:$0xff]  ;;  %v47_v9 = vld [vmem:[#allocation5 + $0x28] sm:$0xff]  ;;  %v48_v11 = vld [vmem:[#allocation5 + $0x30] sm:$0xff]  ;;  %s142_s12 = sshll.u32 %s316_s11, 4  ;;  %s143_s12 = int_to_ptr.vmem [resolvable:$true] %s142_s12 }
  0x29   :  { %v212_v10 = vpack.c.bf16 %v47_v9, %v46_v8  ;;  %v49_v12 = vld [vmem:[#allocation5 + $0x38] sm:$0xff]  ;;  %v50_v14 = vld [vmem:[#allocation5 + $0x40] sm:$0xff]  ;;  %v51_v15 = vld [vmem:[#allocation5 + $0x48] sm:$0xff]  ;;  %s281_s13 = scalar_lea.vmem %s143_s12, 128  ;;  %p286_p3 = scmp.lt.s32.totalorder %s143_s12, %s143_s12 }
  0x2a   :  { %207 = vmatpush3.bf16.msra.mxu0 %v206_v5  ;;  %v215_v13 = vpack.c.bf16 %v49_v12, %v48_v11  ;;  %v218_v16 = vpack.c.bf16 %v51_v15, %v50_v14  ;;  %v52_v17 = vld [vmem:[#allocation5 + $0x50] sm:$0xff]  ;;  %v53_v18 = vld [vmem:[#allocation5 + $0x58] sm:$0xff]  ;;  %v54_v20 = vld [vmem:[#allocation5 + $0x60] sm:$0xff]  ;;  %p282_p2 = scmp.ne.s32.totalorder %s143_s12, %s281_s13  ;;  %p287_p4 = scmp.lt.s32.totalorder %s281_s13, %s281_s13 }
  0x2b   :  { %208 = vmatprep.subr.bf16.mxu0 %v313_v0  ;;  %v221_v19 = vpack.c.bf16 %v53_v18, %v52_v17  ;;  %v55_v21 = vld [vmem:[#allocation5 + $0x68] sm:$0xff]  ;;  %v56_v23 = vld [vmem:[#allocation5 + $0x70] sm:$0xff]  ;;  %v57_v24 = vld [vmem:[#allocation5 + $0x78] sm:$0xff] }
  0x2c   :  { %v224_v22 = vpack.c.bf16 %v55_v21, %v54_v20  ;;  %v227_v25 = vpack.c.bf16 %v57_v24, %v56_v23  ;;  %v41_v26 = vld [vmem:[#allocation2] sm:$0xff]  ;;  %p288_p5 = por %p287_p4, %p286_p3 }
  0x2d   :  { %v152_v27 = vld [vmem:[%s385_s2] ss:$0 sm:$0xff] }
  0x2e   :  { %210 = vmatpush3.bf16.msra.mxu0 %v209_v7  ;;  %p289_p6 = pnand %p288_p5, %p282_p2 }
  0x2f   :  { %211 = vmatprep.subr.bf16.mxu0 %v313_v0 }
  0x32   :  { %213 = vmatpush3.bf16.msra.mxu0 %v212_v10 }
  0x33   :  { %214 = vmatprep.subr.bf16.mxu0 %v313_v0 }
  0x36   :  { %216 = vmatpush3.bf16.msra.mxu0 %v215_v13 }
  0x37   :  { %217 = vmatprep.subr.bf16.mxu0 %v313_v0 }
  0x3a   :  { %219 = vmatpush3.bf16.msra.mxu0 %v218_v16 }
  0x3b   :  { %220 = vmatprep.subr.bf16.mxu0 %v313_v0 }
  0x3e   :  { %222 = vmatpush3.bf16.msra.mxu0 %v221_v19 }
  0x3f   :  { %223 = vmatprep.subr.bf16.mxu0 %v313_v0 }
  0x42   :  { %225 = vmatpush3.bf16.msra.mxu0 %v224_v22 }
  0x43   :  { %226 = vmatprep.subr.bf16.mxu0 %v313_v0 }
  0x46   :  { %228 = vmatpush3.bf16.msra.mxu0 %v227_v25 }
  0x49   :  { %203 = vmatmul.mubr.f32.vlgmr.msra.gmra.mrb[0].mxu0 %v41_v26 }
 0x11c   :  { %v131_v28 = vpop.f32.mrb[0].mxu0 }
 0x11d   :  { %v132_v29 = vadd.f32 %v152_v27, %v131_v28  ;;  %v204_v30 = vpop.f32.mrb[1].mxu0 }
 0x11f   :  { %135 = vst [vmem:[#allocation7] sm:$0xff] %v132_v29 }
 0x120   :  { %292 = shalt.err (!%p289_p6)
}
 0x121   :  { %s293_s16 = scalar_lea.hbm %s386_s3, 128 }
 0x122   :  { %p294_p7 = scmp.ne.s32.totalorder %s386_s3, %s293_s16  ;;  %p297_p8 = scmp.lt.u32.totalorder %s293_s16, %s386_s3 }
 0x124   :  { %p299_p9 = pnand %p297_p8, %p294_p7 }
 0x126   :  { %302 = shalt.err (!%p299_p9)
}
 0x127   :  { %145 = dma.vmem_to_hbm [thread:$0]  %s143_s12, 128, %s386_s3, [#allocation4]  }
 0x128   :  { %307 = dma.done.wait [#allocation4], 128  }
 0x129   :  { %308 = vsyncadd [#allocation4], 4294967168 }
 0x12a   :  { %149 = vsyncpa [#allocation3], 1 }
 0x12b   :  { %150 = vsyncpa [#allocation6], 1 }
 0x12c   :  { %151 = vsyncpa [#allocation4], 1 }

</bundles_post_ra>
